<compile_context>
chip_gen: v6e
topology: v6e:2x2x1
jax: 0.10.0
libtpu: 0.0.40
codegen_flags: <defaults>
</compile_context>

<pallas_src>
import functools

import jax
import jax.numpy as jnp
from jax.experimental import pallas as pl
from jax.experimental.pallas import tpu as pltpu


def _mlp_step_score_kernel(state_ref, xb_ref, mask_ref, w1h_ref, w2_ref,
                           b2_ref, out_ref, *, normalize):
    # state_ref: (TM, Ds)   xb_ref: (Nx, H)   mask_ref/out_ref: (TM, Nx)
    # w1h_ref:   (Ds, H)    w2_ref: (1, H)    b2_ref: (1,) f32 scalar in SMEM
    a = jnp.dot(state_ref[...], w1h_ref[...],
                preferred_element_type=jnp.float32)              # (TM, H)  MXU

    # Outer pairing via broadcast; xb already contains +b1.
    pre = a[:, None, :] + xb_ref[...][None, :, :]                # (TM, Nx, H)
    hid = jnp.maximum(pre, 0.0)                                  # ReLU (VPU)

    # Second layer (H -> 1): VPU multiply + lane reduce (no reshape, no MXU).
    score = jnp.sum(hid * w2_ref[...][None, :, :], axis=-1)      # (TM, Nx)
    score = score + b2_ref[0]

    # score = score * mask + (1 - mask) * -1e10   (binary masks -> one select)
    score = jnp.where(mask_ref[...] != 0.0, score, -10000000000.0)

    if normalize:
        # log_softmax over the x axis; exp/log lower to the EUP slot.
        mx = jnp.max(score, axis=-1, keepdims=True)
        sh = score - mx
        lse = jnp.log(jnp.sum(jnp.exp(sh), axis=-1, keepdims=True))
        out_ref[...] = sh - lse
    else:
        out_ref[...] = score


def _auto_tile_m(num_states, num_x, hdim):
    """Largest state tile whose (TM, Nx, H) f32 intermediates fit in VMEM."""
    budget = 8 * 1024 * 1024          # ~8 MiB of intermediates: comfortably
                                      # inside scoped VMEM on v5e/v6e and v7x.
    per_row = 2 * num_x * hdim * 4 + 4 * num_x * 4
    tm = budget // max(per_row, 1)
    tm = min(tm, 512)
    tm = max(8, (tm // 8) * 8)
    if num_states > 8:
        # Keep >= 2 grid steps so the 'parallel' axis can feed both v7x cores.
        half = (((num_states + 1) // 2) + 7) // 8 * 8
        tm = min(tm, half)
    return tm


def mlp_step_score(state, x, w1, b1, w2, b2, masks=None, *,
                   step_score_normalize=True, tile_m=None, matmul_dtype=None):
    """is_outer=True forward pass of MLPStepScore."""
    num_states, d_state = state.shape
    num_x, d_x = x.shape
    hdim = w1.shape[1]
    assert w1.shape[0] == d_state + d_x

    w1h = w1[:d_state, :]                                   # (Ds, H)
    w1x = w1[d_state:, :]                                   # (Dx, H)

    # Hoisted x-side partial product + b1 (computed once, resident in VMEM).
    xb = (x.astype(jnp.float32) @ w1x.astype(jnp.float32)
          + b1.astype(jnp.float32)[None, :])                # (Nx, H)

    if masks is None:
        masks = jnp.ones((num_states, num_x), jnp.float32)
    masks = masks.astype(jnp.float32)

    # Optional bf16 cast for the in-kernel MXU matmul (accumulate in f32).
    mm_dtype = jnp.float32 if matmul_dtype is None else matmul_dtype
    state_mm = state.astype(mm_dtype)
    w1h_mm = w1h.astype(mm_dtype)

    if tile_m is None:
        tile_m = _auto_tile_m(num_states, num_x, hdim)

    # Pad num_states up to a multiple of tile_m (ragged batches supported).
    padded = ((num_states + tile_m - 1) // tile_m) * tile_m
    if padded != num_states:
        pad = padded - num_states
        state_mm = jnp.pad(state_mm, ((0, pad), (0, 0)))
        masks = jnp.pad(masks, ((0, pad), (0, 0)), constant_values=1.0)

    w2_row = w2.reshape(1, hdim).astype(jnp.float32)        # (1, H)
    b2_s = b2.reshape(1).astype(jnp.float32)                # (1,) scalar

    grid = (padded // tile_m,)
    kernel = functools.partial(_mlp_step_score_kernel,
                               normalize=step_score_normalize)

    out = pl.pallas_call(
        kernel,
        out_shape=jax.ShapeDtypeStruct((padded, num_x), jnp.float32),
        grid_spec=pltpu.PrefetchScalarGridSpec(
            num_scalar_prefetch=0,
            grid=grid,
            in_specs=[
                pl.BlockSpec((tile_m, d_state), lambda i: (i, 0)),   # state
                pl.BlockSpec((num_x, hdim), lambda i: (0, 0)),       # xb (res.)
                pl.BlockSpec((tile_m, num_x), lambda i: (i, 0)),     # mask
                pl.BlockSpec((d_state, hdim), lambda i: (0, 0)),     # W1_h
                pl.BlockSpec((1, hdim), lambda i: (0, 0)),           # w2 row
                pl.BlockSpec(memory_space=pltpu.MemorySpace.SMEM),   # b2 scalar
            ],
            out_specs=pl.BlockSpec((tile_m, num_x), lambda i: (i, 0)),
        ),
        compiler_params=pltpu.CompilerParams(
            dimension_semantics=("parallel",)),
    )(state_mm, xb, masks, w1h_mm, w2_row, b2_s)

    return out[:num_states]


def _reference(state, x, masks, w1, b1, w2, b2):
    """Pure-JAX replica of the PyTorch forward (is_outer=True)."""
    num_states = state.shape[0]
    num_x = x.shape[0]
    h = jnp.repeat(state, num_x, axis=0)          # repeat_interleave
    xr = jnp.tile(x, (num_states, 1))             # repeat
    cat = jnp.concatenate([h, xr], axis=-1)
    hid = jnp.maximum(cat @ w1 + b1, 0.0)
    score = (hid @ w2 + b2).reshape(num_states, num_x)
    score = score * masks + (1.0 - masks) * (-10000000000.0)
    return jax.nn.log_softmax(score, axis=-1)


if __name__ == "__main__":
    key = jax.random.PRNGKey(0)
    k_state, k_x, k_mask, k_w1, k_b1, k_w2, k_b2 = jax.random.split(key, 7)

    num_states, num_x = 16, 8
    d_state, d_x, hidden = 16, 16, 32          # sizes = [32, 32, 1]

    state = jax.random.normal(k_state, (num_states, d_state), jnp.float32)
    x = jax.random.normal(k_x, (num_x, d_x), jnp.float32)
    masks = (jax.random.uniform(k_mask, (num_states, num_x)) > 0.2).astype(jnp.float32)

    # Deterministic synthetic MLP parameters (sizes[0]=d_state+d_x -> hidden -> 1).
    w1 = 0.1 * jax.random.normal(k_w1, (d_state + d_x, hidden), jnp.float32)
    b1 = 0.1 * jax.random.normal(k_b1, (hidden,), jnp.float32)
    w2 = 0.1 * jax.random.normal(k_w2, (hidden, 1), jnp.float32)
    b2 = 0.1 * jax.random.normal(k_b2, (1,), jnp.float32)

    out = mlp_step_score(state, x, w1, b1, w2, b2, masks,
                         step_score_normalize=True)
    out = jax.block_until_ready(out)

    ref = _reference(state, x, masks, w1, b1, w2, b2)
    assert out.shape == (num_states, num_x)
    assert jnp.allclose(out, ref, rtol=1e-4, atol=1e-4), "mismatch vs reference"

    print("KERNEL_OK")
</pallas_src>

<mosaic_0001>
module attributes {stable_mosaic.version = 11 : i64} {
  func.func @_mlp_step_score_kernel(%arg0: i32, %arg1: memref<8x16xf32, #tpu.memory_space<vmem>>, %arg2: memref<8x32xf32, #tpu.memory_space<vmem>>, %arg3: memref<8x8xf32, #tpu.memory_space<vmem>>, %arg4: memref<16x32xf32, #tpu.memory_space<vmem>>, %arg5: memref<1x32xf32, #tpu.memory_space<vmem>>, %arg6: memref<1xf32, #tpu.memory_space<smem>>, %arg7: memref<8x8xf32, #tpu.memory_space<vmem>>) attributes {dimension_semantics = [#tpu.dimension_semantics<parallel>], iteration_bounds = array<i64: 2>, scalar_prefetch = 0 : i64, scratch_operands = 0 : i64, tpu.core_type = #tpu.core_type<tc>, window_params = [{transform_indices = @transform_0, window_bounds = array<i64: 8, 16>}, {pipeline_mode = #tpu.pipeline_mode<synchronous>, transform_indices = @transform_1, window_bounds = array<i64: 8, 32>}, {transform_indices = @transform_2, window_bounds = array<i64: 8, 8>}, {pipeline_mode = #tpu.pipeline_mode<synchronous>, transform_indices = @transform_3, window_bounds = array<i64: 16, 32>}, {pipeline_mode = #tpu.pipeline_mode<synchronous>, transform_indices = @transform_4, window_bounds = array<i64: 1, 32>}, {transform_indices = @transform_5, window_bounds = array<i64: 1>}, {transform_indices = @transform_6, window_bounds = array<i64: 8, 8>}]} {
    %c0 = arith.constant 0 : index
    %c0_0 = arith.constant 0 : index
    %0 = vector.load %arg1[%c0, %c0_0] : memref<8x16xf32, #tpu.memory_space<vmem>>, vector<8x16xf32>
    %c0_1 = arith.constant 0 : index
    %c0_2 = arith.constant 0 : index
    %1 = vector.load %arg4[%c0_1, %c0_2] : memref<16x32xf32, #tpu.memory_space<vmem>>, vector<16x32xf32>
    %cst = arith.constant dense<0.000000e+00> : vector<8x32xf32>
    %2 = tpu.matmul %0, %1, %cst {dimension_numbers = #tpu.dot_dimension_numbers<[1], [0], [0], [1], [0, 0, 1, 1], [], []>} : vector<8x16xf32>, vector<16x32xf32>, vector<8x32xf32> -> vector<8x32xf32>
    %3 = vector.shape_cast %2 : vector<8x32xf32> to vector<8x1x32xf32>
    %c0_3 = arith.constant 0 : index
    %c0_4 = arith.constant 0 : index
    %4 = vector.load %arg2[%c0_3, %c0_4] : memref<8x32xf32, #tpu.memory_space<vmem>>, vector<8x32xf32>
    %5 = vector.shape_cast %4 : vector<8x32xf32> to vector<1x8x32xf32>
    %6 = vector.broadcast %3 : vector<8x1x32xf32> to vector<8x8x32xf32>
    %7 = vector.broadcast %5 : vector<1x8x32xf32> to vector<8x8x32xf32>
    %8 = arith.addf %6, %7 : vector<8x8x32xf32>
    %cst_5 = arith.constant 0.000000e+00 : f32
    %9 = vector.broadcast %cst_5 : f32 to vector<8x8x32xf32>
    %10 = arith.maximumf %8, %9 : vector<8x8x32xf32>
    %c0_6 = arith.constant 0 : index
    %c0_7 = arith.constant 0 : index
    %11 = vector.load %arg5[%c0_6, %c0_7] : memref<1x32xf32, #tpu.memory_space<vmem>>, vector<1x32xf32>
    %12 = vector.shape_cast %11 : vector<1x32xf32> to vector<1x1x32xf32>
    %13 = vector.broadcast %12 : vector<1x1x32xf32> to vector<8x8x32xf32>
    %14 = arith.mulf %10, %13 : vector<8x8x32xf32>
    %cst_8 = arith.constant dense<0.000000e+00> : vector<8x8xf32>
    %15 = vector.multi_reduction <add>, %14, %cst_8 [2] : vector<8x8x32xf32> to vector<8x8xf32>
    %c0_9 = arith.constant 0 : index
    %16 = memref.load %arg6[%c0_9] : memref<1xf32, #tpu.memory_space<smem>>
    %17 = vector.broadcast %16 : f32 to vector<8x8xf32>
    %18 = arith.addf %15, %17 : vector<8x8xf32>
    %c0_10 = arith.constant 0 : index
    %c0_11 = arith.constant 0 : index
    %19 = vector.load %arg3[%c0_10, %c0_11] : memref<8x8xf32, #tpu.memory_space<vmem>>, vector<8x8xf32>
    %cst_12 = arith.constant 0.000000e+00 : f32
    %20 = vector.broadcast %cst_12 : f32 to vector<8x8xf32>
    %21 = arith.cmpf one, %19, %20 : vector<8x8xf32>
    %cst_13 = arith.constant -1.000000e+10 : f32
    %22 = vector.broadcast %cst_13 : f32 to vector<8x8xf32>
    %23 = arith.select %21, %18, %22 : vector<8x8xi1>, vector<8x8xf32>
    %cst_14 = arith.constant dense<0xFF800000> : vector<8xf32>
    %24 = vector.multi_reduction <maximumf>, %23, %cst_14 [1] : vector<8x8xf32> to vector<8xf32>
    %25 = vector.shape_cast %24 : vector<8xf32> to vector<8x1xf32>
    %26 = vector.broadcast %25 : vector<8x1xf32> to vector<8x8xf32>
    %27 = arith.subf %23, %26 : vector<8x8xf32>
    %28 = math.exp %27 : vector<8x8xf32>
    %cst_15 = arith.constant dense<0.000000e+00> : vector<8xf32>
    %29 = vector.multi_reduction <add>, %28, %cst_15 [1] : vector<8x8xf32> to vector<8xf32>
    %30 = vector.shape_cast %29 : vector<8xf32> to vector<8x1xf32>
    %31 = math.log %30 : vector<8x1xf32>
    %32 = vector.broadcast %31 : vector<8x1xf32> to vector<8x8xf32>
    %33 = arith.subf %27, %32 : vector<8x8xf32>
    %c0_16 = arith.constant 0 : index
    %c0_17 = arith.constant 0 : index
    %34 = vector.load %arg7[%c0_16, %c0_17] : memref<8x8xf32, #tpu.memory_space<vmem>>, vector<8x8xf32>
    tpu.vector_store %arg7[%c0_16, %c0_17], %33 {strides = array<i32>} : memref<8x8xf32, #tpu.memory_space<vmem>>, vector<8x8xf32>,
    return
  }
  func.func @transform_0(%arg0: i32) -> (i32, i32) {
    %c0_i32 = arith.constant 0 : i32
    %c0_i32_0 = arith.constant 0 : i32
    return %arg0, %c0_i32 : i32, i32
  }
  func.func @transform_1(%arg0: i32) -> (i32, i32) {
    %c0_i32 = arith.constant 0 : i32
    %c0_i32_0 = arith.constant 0 : i32
    %c0_i32_1 = arith.constant 0 : i32
    return %c0_i32, %c0_i32_0 : i32, i32
  }
  func.func @transform_2(%arg0: i32) -> (i32, i32) {
    %c0_i32 = arith.constant 0 : i32
    %c0_i32_0 = arith.constant 0 : i32
    return %arg0, %c0_i32 : i32, i32
  }
  func.func @transform_3(%arg0: i32) -> (i32, i32) {
    %c0_i32 = arith.constant 0 : i32
    %c0_i32_0 = arith.constant 0 : i32
    %c0_i32_1 = arith.constant 0 : i32
    return %c0_i32, %c0_i32_0 : i32, i32
  }
  func.func @transform_4(%arg0: i32) -> (i32, i32) {
    %c0_i32 = arith.constant 0 : i32
    %c0_i32_0 = arith.constant 0 : i32
    %c0_i32_1 = arith.constant 0 : i32
    return %c0_i32, %c0_i32_0 : i32, i32
  }
  func.func @transform_5(%arg0: i32) -> i32 {
    %c0_i32 = arith.constant 0 : i32
    %c0_i32_0 = arith.constant 0 : i32
    return %c0_i32 : i32
  }
  func.func @transform_6(%arg0: i32) -> (i32, i32) {
    %c0_i32 = arith.constant 0 : i32
    %c0_i32_0 = arith.constant 0 : i32
    return %arg0, %c0_i32 : i32, i32
  }
}

</mosaic_0001>

<bundles_post_ra>
// kernel: tpu_custom_call.1
= control target key start
LH: loop header
LB: loop body
LE: loop exit
PB: predicated region body
PF: predicated region fallthrough
CT: control target
= control target key end

     0   :  { %s873_s0 = inlined_call_operand.vmem [shape: f32[16,16], index: 0, kind: input, shape index: {}]   ;;  %s874_s1 = inlined_call_operand.vmem [shape: f32[8,32], index: 1, kind: input, shape index: {}]   ;;  %s875_s2 = inlined_call_operand.vmem [shape: f32[16,8], index: 2, kind: input, shape index: {}]   ;;  %s876_s3 = inlined_call_operand.hbm [shape: f32[16,32], index: 3, kind: input, shape index: {}]   ;;  %s877_s4 = inlined_call_operand.vmem [shape: f32[1,32], index: 4, kind: input, shape index: {}]   ;;  %s878_s5 = inlined_call_operand.<no memory space> [shape: f32[1], index: 5, kind: input, shape index: {}]   ;;  %s879_s6 = inlined_call_operand.vmem [shape: f32[16,8], index: 6, kind: output, shape index: {}]  }
   0x1   :  { %11 = sst [smem:[#allocation2]] %s878_s5 }
   0x2   :  { %12 = vsyncpa [#allocation4], 0  ;;  %s799_s23 = smov 0  }
   0x3 LB: > { %s805_s24 = sadd.s32 4294967295, %s753_s23   ;;  %p667_p0 = scmp.ge.s32.totalorder %s753_s23, 1  ;;  %s753_s23 = sphi %s799_s23, %s18_s23  }
   0x4   : > { %p185_p1 = scmp.lt.s32.totalorder %s753_s23, 3  ;;  %s755_s25 = smov [#allocation3]  }
   0x5   : > { %s200_s26 = sshll.u32 %s755_s25, 4  ;;  %p697_p3 = scmp.eq.s32.totalorder %s805_s24, 0  ;;  %s201_s26 = int_to_ptr.vmem [resolvable:$true] %s200_s26 }
   0x6   : > { %p809_p2 = pnand %p667_p0, %p185_p1  ;;  %s728_s27 = scalar_lea.vmem %s201_s26, 256 }
   0x7   : > { %p729_p7 = scmp.ne.s32.totalorder %s201_s26, %s728_s27  ;;  %p736_p10 = scmp.lt.s32.totalorder %s201_s26, %s201_s26 }
   0x8   : > { %p693_p4 = pneg %p809_p2  ;;  %p737_p11 = scmp.lt.s32.totalorder %s728_s27, %s728_s27 }
   0xa   : > { %p694_p5 = pnand %p697_p3, %p693_p4  ;;  %p738_p12 = por %p737_p11, %p736_p10 }
   0xc   : > { %p719_p6 = pneg %p694_p5 }
   0xe   : > { %p731_p8 = pnand %p729_p7, %p719_p6 }
  0x10   : > { %p732_p9 = pneg %p731_p8 }
  0x12   : > { %p739_p13 = pnand %p738_p12, %p732_p9 }
  0x14   : > { %742 = shalt.err (!%p739_p13)
}
  0x15   : > { %s756_s28 = smov 128   ;;  %s757_s29 = smov 8  }
  0x16   : > { %696 = dma.hbm_to_vmem [thread:$0]  (!%p694_p5), %s876_s3, 256, %s201_s26, [#allocation4], %s756_s28, %s756_s28, %s757_s29  }
  0x17   : > { %236 = sbr.rel (%p809_p2) target bundleno = 714 (0x2ca), region = 44 }
  0x1c   : > { %748 = dma.done.wait (%p697_p3), [#allocation4], 256  }
  0x1d   : > { %750 = vsyncadd (%p697_p3), [#allocation4], 4294967040  ;;  %p268_p0 = scmp.lt.s32.totalorder %s805_s24, 1  ;;  %v758_v0 = vmov 0.0   ;;  %vm759_vm0 = vmmov 0   ;;  %v282_v1 = vld [vmem:[#allocation3 + $0x8] sm:$0xff]  ;;  %v362_v4 = vlaneseq }
  0x1e   : > { %682 = vmatprep.subr.mxu0 %v758_v0  ;;  %686 = vmatprep.mubr.msk.f32.mxu0 %vm759_vm0, %v758_v0  ;;  %v281_v2 = vld [vmem:[#allocation3] sm:$0xff]  ;;  %vm283_vm1 = vcmask 130048   ;;  %v760_v8 = vmov 1966171168   ;;  %vm479_vm2 = vcmask 261120   ;;  %s504_s16 = sld [smem:[#allocation2]] }
  0x1f   : > { %s882_s24 = smov (!%p268_p0, %s805_s24), 1  ;;  %683 = vmatpush3.msra.mxu0 %v282_v1  ;;  %v363_v5 = vshrl.u32 %v362_v4, 7  ;;  %v525_v6 = vand.u32 127, %v362_v4  ;;  %v360_v9 = vunpack.c.l.s4 %v760_v8  ;;  %v407_v24 = vld [vmem:[%s874_s1] sm:$0xff]  ;;  %vm558_vm3 = vcmask 1041409  }
  0x20   : > { %s829_s8 = sshll.u32 %s882_s24, 3  ;;  %684 = vmatprep.subr.mxu0 %v758_v0  ;;  %v676_v33 = vld [vmem:[%s877_s4] ss:$0 sm:$0xff]  ;;  %vm560_vm4 = vcmask 1042434   ;;  %vm562_vm5 = vcmask 1043459   ;;  %vm564_vm6 = vcmask 1044484  }
  0x21   : > { %s271_s11 = scalar_lea.vmem %s873_s0, %s829_s8  ;;  %685 = vmatpush3.msra.mxu0 %v281_v2  ;;  %v835_v7 = vsub.s32 %v525_v6, %v363_v5  ;;  %v361_v10 = vunpack.c.0.s8 %v360_v9  ;;  %v410_v15 = vsub.s32 0, %v363_v5  ;;  %s275_s19 = scalar_lea.vmem %s875_s2, %s829_s8  ;;  %vm566_vm7 = vcmask 1045509  }
  0x22   : > { %v280_v3 = vld [vmem:[%s271_s11] sm:$0xff]  ;;  %vm568_vm8 = vcmask 1046534   ;;  %vm570_vm9 = vcmask 1047559   ;;  %vm574_vm11 = vcmask 64512   ;;  %s279_s22 = scalar_lea.vmem %s879_s6, %s829_s8 }
  0x23   : > { %687 = vmatmul.mubr.msk.f32.vlgmr.msra.gmra.mxu0 %vm283_vm1, %v280_v3  ;;  %v364_v11 = vsub.s32 %v361_v10, %v363_v5 }
  0x24   : > { %v505_v6 = vstv %s504_s16 }
  0xe3   : > { %v353_v12 = vpop.f32.mrf.mxu0 }
  0xe4   : > { %v358_v13 = vcombine.high %v353_v12, %v353_v12  ;;  %v365_v14 = vrot.slane %v353_v12, %v364_v11 }
  0xe5   : > { %v688_v16 = vpop.f32.mrf.mxu0 }
  0xe6   : > { %v372_v17 = vrot.slane %v358_v13, %v364_v11  ;;  %v373_v18 = vcombine.high %v365_v14, %v365_v14  ;;  %v381_v19 = vrot.slane %v365_v14, %v364_v11 }
  0xe8   : > { %v374_v20 = vcombine.high %v372_v17, %v372_v17  ;;  %v388_v21 = vrot.slane %v372_v17, %v364_v11  ;;  %v395_v22 = vrot.slane %v373_v18, %v364_v11  ;;  %v403_v23 = vcombine.high %v381_v19, %v381_v19 }
  0xe9   : > { %v411_v25 = vrot.slane %v381_v19, %v410_v15 }
  0xea   : > { %v402_v26 = vrot.slane %v374_v20, %v364_v11  ;;  %v404_v27 = vcombine.high %v388_v21, %v388_v21  ;;  %v405_v28 = vcombine.high %v395_v22, %v395_v22  ;;  %v419_v29 = vrot.slane %v403_v23, %v410_v15 }
  0xeb   : > { %v448_v30 = vadd.f32 %v411_v25, %v407_v24  ;;  %v415_v31 = vrot.slane %v395_v22, %v410_v15  ;;  %v427_v32 = vrot.slane %v388_v21, %v410_v15 }
  0xec   : > { %v450_v34 = vadd.f32 %v419_v29, %v407_v24  ;;  %v423_v35 = vrot.slane %v405_v28, %v410_v15  ;;  %v431_v36 = vrot.slane %v402_v26, %v410_v15  ;;  %v435_v37 = vrot.slane %v404_v27, %v410_v15 }
  0xed   : > { %v456_v38 = vmax.f32 %v448_v30, 0.0  ;;  %v449_v39 = vadd.f32 %v415_v31, %v407_v24  ;;  %v452_v40 = vadd.f32 %v427_v32, %v407_v24  ;;  %v406_v41 = vcombine.high %v402_v26, %v402_v26 }
  0xee   : > { %v458_v42 = vmax.f32 %v450_v34, 0.0  ;;  %v451_v43 = vadd.f32 %v423_v35, %v407_v24  ;;  %v453_v44 = vadd.f32 %v431_v36, %v407_v24  ;;  %v454_v53 = vadd.f32 %v435_v37, %v407_v24 }
  0xef   : > { %v471_v45 = vmul.f32 %v676_v33, %v456_v38  ;;  %v457_v46 = vmax.f32 %v449_v39, 0.0  ;;  %v439_v47 = vrot.slane %v406_v41, %v410_v15  ;;  %v460_v52 = vmax.f32 %v452_v40, 0.0 }
  0xf0   : > { %v473_v48 = vmul.f32 %v676_v33, %v458_v42  ;;  %v459_v49 = vmax.f32 %v451_v43, 0.0  ;;  %v461_v56 = vmax.f32 %v453_v44, 0.0  ;;  %v462_v60 = vmax.f32 %v454_v53, 0.0 }
  0xf1   : > { %v480_v50 = vsel %vm479_vm2, %v471_v45, 0.0  ;;  %v472_v51 = vmul.f32 %v676_v33, %v457_v46  ;;  %v455_v57 = vadd.f32 %v439_v47, %v407_v24  ;;  %v475_v59 = vmul.f32 %v676_v33, %v460_v52 }
  0xf2   : > { %481 = vadd.xlane.f32.xlu0 %v480_v50  ;;  %v486_v54 = vsel %vm479_vm2, %v473_v48, 0.0  ;;  %v474_v55 = vmul.f32 %v676_v33, %v459_v49  ;;  %v476_v62 = vmul.f32 %v676_v33, %v461_v56  ;;  %v477_v1 = vmul.f32 %v676_v33, %v462_v60 }
  0xf3   : > { %487 = vadd.xlane.f32.xlu1 %v486_v54  ;;  %v483_v58 = vsel %vm479_vm2, %v472_v51, 0.0  ;;  %v463_v63 = vmax.f32 %v455_v57, 0.0  ;;  %v492_v0 = vsel %vm479_vm2, %v475_v59, 0.0 }
  0xf4   : > { %v489_v61 = vsel %vm479_vm2, %v474_v55, 0.0  ;;  %v495_v2 = vsel %vm479_vm2, %v476_v62, 0.0  ;;  %v498_v4 = vsel %vm479_vm2, %v477_v1, 0.0 }
  0xf5   : > { %v478_v3 = vmul.f32 %v676_v33, %v463_v63  ;;  %v514_v33 = vld [vmem:[%s275_s19] sm:$0xff] }
  0xf6   : > { %484 = vadd.xlane.f32.xlu0 %v483_v58  ;;  %vm515_vm10 = vcmp.ne.f32.partialorder %v514_v33, 0.0 }
  0xf7   : > { %490 = vadd.xlane.f32.xlu1 %v489_v61  ;;  %v501_v5 = vsel %vm479_vm2, %v478_v3, 0.0 }
  0xfa   : > { %493 = vadd.xlane.f32.xlu0 %v492_v0 }
  0xfb   : > { %496 = vadd.xlane.f32.xlu1 %v495_v2 }
  0xfe   : > { %499 = vadd.xlane.f32.xlu0 %v498_v4 }
  0xff   : > { %502 = vadd.xlane.f32.xlu1 %v501_v5 }
 0x17b   : > { %v482_v8 = vpop.xlane.xlu0 %481 }
 0x17c   : > { %v488_v9 = vpop.xlane.xlu1 %487  ;;  %v506_v10 = vadd.f32 %v505_v6, %v482_v8 }
 0x17d   : > { %v508_v11 = vadd.f32 %v505_v6, %v488_v9 }
 0x17e   : > { %v529_v16 = vrot.slane %v506_v10, %v835_v7 }
 0x17f   : > { %v485_v12 = vpop.xlane.xlu0 %484  ;;  %v537_v18 = vrot.slane %v508_v11, %v835_v7 }
 0x180   : > { %v507_v13 = vadd.f32 %v505_v6, %v485_v12  ;;  %v491_v14 = vpop.xlane.xlu1 %490 }
 0x181   : > { %v509_v15 = vadd.f32 %v505_v6, %v491_v14 }
 0x182   : > { %v533_v17 = vrot.slane %v507_v13, %v835_v7 }
 0x183   : > { %v541_v19 = vrot.slane %v509_v15, %v835_v7  ;;  %v494_v20 = vpop.xlane.xlu0 %493 }
 0x184   : > { %v559_v21 = vsel %vm558_vm3, %v533_v17, %v529_v16  ;;  %v510_v22 = vadd.f32 %v505_v6, %v494_v20  ;;  %v497_v23 = vpop.xlane.xlu1 %496 }
 0x185   : > { %v561_v24 = vsel %vm560_vm4, %v537_v18, %v559_v21  ;;  %v511_v25 = vadd.f32 %v505_v6, %v497_v23 }
 0x186   : > { %v563_v26 = vsel %vm562_vm5, %v541_v19, %v561_v24  ;;  %v545_v27 = vrot.slane %v510_v22, %v835_v7 }
 0x187   : > { %v549_v28 = vrot.slane %v511_v25, %v835_v7  ;;  %v500_v29 = vpop.xlane.xlu0 %499 }
 0x188   : > { %v565_v30 = vsel %vm564_vm6, %v545_v27, %v563_v26  ;;  %v512_v31 = vadd.f32 %v505_v6, %v500_v29  ;;  %v503_v32 = vpop.xlane.xlu1 %502 }
 0x189   : > { %v513_v34 = vadd.f32 %v505_v6, %v503_v32  ;;  %v567_v35 = vsel %vm566_vm7, %v549_v28, %v565_v30 }
 0x18a   : > { %v553_v36 = vrot.slane %v512_v31, %v835_v7 }
 0x18b   : > { %v557_v37 = vrot.slane %v513_v34, %v835_v7 }
 0x18c   : > { %v569_v38 = vsel %vm568_vm8, %v553_v36, %v567_v35 }
 0x18d   : > { %v571_v39 = vsel %vm570_vm9, %v557_v37, %v569_v38 }
 0x18e   : > { %v573_v40 = vsel %vm515_vm10, %v571_v39, -1e+10 }
 0x18f   : > { %v575_v41 = vsel %vm574_vm11, %v573_v40, -inf }
 0x190   : > { %576 = vmax.xlane.f32.xlu0 %v575_v41 }
 0x219   : > { %v577_v42 = vpop.xlane.xlu0 %576 }
 0x21a   : > { %v578_v43 = vsub.f32 %v573_v40, %v577_v42 }
 0x21c   : > { %v579_v44 = vmul.f32 1.442695, %v578_v43 }
 0x21e   : > { %713 = vpow2.f32 %v579_v44 }
 0x22b   : > { %v714_v45 = vpop.eup %713 }
 0x22c   : > { %v581_v46 = vsel %vm574_vm11, %v714_v45, 0.0 }
 0x22d   : > { %582 = vadd.xlane.f32.xlu1 %v581_v46 }
 0x2b6   : > { %v583_v47 = vpop.xlane.xlu1 %582 }
 0x2b7   : > { %715 = vlog2.f32 %v583_v47 }
 0x2c4   : > { %v716_v7 = vpop.eup %715 }
 0x2c5   : > { %v585_v48 = vmul.f32 0.6931472, %v716_v7 }
 0x2c7   : > { %v586_v49 = vsub.f32 %v578_v43, %v585_v48 }
 0x2c9   : > { %587 = vst.msk [vmem:[%s279_s22] sm:$0xff] %vm574_vm11, %v586_v49 }
 0x2ca PF: > { %s18_s23 = sadd.s32 1, %s753_s23  }
 0x2cb   : > { %p15_p1 = scmp.ge.s32.totalorder %s18_s23, 4  }
 0x2cd   :  { %17 = sbr.rel (!%p15_p1) target bundleno = 3 (0x3), region = 82 }
 0x2d2   :  { %607 = vsyncpa [#allocation4], 1 }
 0x2d3   :  { %609 = vsyncpa [#allocation4 + $0x1], 1 }

</bundles_post_ra>
